<compile_context>
chip_gen: v6e
topology: v6e:2x2x1
jax: 0.10.0
libtpu: 0.0.40
codegen_flags: <defaults>
</compile_context>

<pallas_src>
from math import sqrt

import jax
import jax.numpy as jnp
from jax.experimental import pallas as pl
from jax.experimental.pallas import tpu as pltpu

P_DROP = 0.4       # F.dropout(p=0.4) in the classification head (training mode)
P_DROP_ATT = 0.5   # nn.Dropout(0.5) inside MultiHeadSelfAttentionLayers
BN_EPS = 1e-5
LN_EPS = 1e-5

# Classification-head layer widths (fixed by the module).
H1, H2, H3, N_OUT = 192, 32, 8, 2
OUT_PAD = 128      # lane-dense output width; logits live in lanes [0, 2)

# ---- packed-parameter slab layouts -----------------------------------------
# f32 "vector" slab: one row vector per 8-aligned sublane slot plus the tiny
# fc4 weight, so the kernel only does sublane-aligned static ref slices.
_R_B1, _R_G1, _R_BE1 = 0, 8, 16
_R_B2, _R_G2, _R_BE2 = 24, 32, 40
_R_B3, _R_G3, _R_BE3 = 48, 56, 64
_R_B4 = 72
_R_W4 = 80                       # rows 80:88 hold fc4 weight padded to (8, 128)
_VEC_ROWS, _VEC_COLS = 88, 256
# f32 dropout-scale slab: one 128-lane-aligned region per dropout layer.
_D_OFF1, _D_OFF2, _D_OFF3, _D_COLS = 0, 256, 384, 512


# =============================================================================
# Pallas kernel: fused classification head
# =============================================================================
def _head_kernel(x_ref, w1_ref, w23_ref, vec_ref, drop_ref, out_ref):
    """fc -> relu -> training-mode BatchNorm1d -> dropout (x3), then fc4."""

    def bn(h, g_row, b_row, n):
        gamma = vec_ref[g_row:g_row + 1, :n]
        beta = vec_ref[b_row:b_row + 1, :n]
        mean = jnp.mean(h, axis=0, keepdims=True)
        var = jnp.mean((h - mean) ** 2, axis=0, keepdims=True)  # biased (torch)
        return gamma * (h - mean) * jax.lax.rsqrt(var + BN_EPS) + beta

    # fc1 -> relu -> bn1 -> dropout    (K zero-padded to a lane multiple)
    h = jnp.dot(x_ref[...].astype(jnp.bfloat16), w1_ref[...],
                preferred_element_type=jnp.float32)
    h = jnp.maximum(h + vec_ref[_R_B1:_R_B1 + 1, :H1], 0.0)
    h = bn(h, _R_G1, _R_BE1, H1) * drop_ref[:, _D_OFF1:_D_OFF1 + H1]

    # fc2 -> relu -> bn2 -> dropout
    h = jnp.dot(h.astype(jnp.bfloat16), w23_ref[0:H1, 0:H2],
                preferred_element_type=jnp.float32)
    h = jnp.maximum(h + vec_ref[_R_B2:_R_B2 + 1, :H2], 0.0)
    h = bn(h, _R_G2, _R_BE2, H2) * drop_ref[:, _D_OFF2:_D_OFF2 + H2]

    # fc3 -> relu -> bn3 -> dropout
    h = jnp.dot(h.astype(jnp.bfloat16), w23_ref[H1:H1 + H2, 0:H3],
                preferred_element_type=jnp.float32)
    h = jnp.maximum(h + vec_ref[_R_B3:_R_B3 + 1, :H3], 0.0)
    h = bn(h, _R_G3, _R_BE3, H3) * drop_ref[:, _D_OFF3:_D_OFF3 + H3]

    # fc4, padded to 128 output lanes for a dense store (f32; K=8, negligible)
    out = jnp.dot(h, vec_ref[_R_W4:_R_W4 + H3, :OUT_PAD],
                  preferred_element_type=jnp.float32)
    out_ref[...] = out + vec_ref[_R_B4:_R_B4 + 1, :OUT_PAD]


def pack_head_operands(head, k_flat):
    """Pack head params (PyTorch (out,in) layout) into the kernel's operands."""
    k_pad = ((k_flat + 127) // 128) * 128

    w1 = jnp.zeros((k_pad, H1), jnp.float32).at[:k_flat, :].set(head["w1"].T)
    w1 = w1.astype(jnp.bfloat16)

    w23 = jnp.zeros((H1 + H2, 128), jnp.float32)
    w23 = w23.at[0:H1, 0:H2].set(head["w2"].T)
    w23 = w23.at[H1:H1 + H2, 0:H3].set(head["w3"].T)
    w23 = w23.astype(jnp.bfloat16)

    vec = jnp.zeros((_VEC_ROWS, _VEC_COLS), jnp.float32)
    vec = vec.at[_R_B1, :H1].set(head["b1"])
    vec = vec.at[_R_G1, :H1].set(head["g1"])
    vec = vec.at[_R_BE1, :H1].set(head["be1"])
    vec = vec.at[_R_B2, :H2].set(head["b2"])
    vec = vec.at[_R_G2, :H2].set(head["g2"])
    vec = vec.at[_R_BE2, :H2].set(head["be2"])
    vec = vec.at[_R_B3, :H3].set(head["b3"])
    vec = vec.at[_R_G3, :H3].set(head["g3"])
    vec = vec.at[_R_BE3, :H3].set(head["be3"])
    vec = vec.at[_R_B4, :N_OUT].set(head["b4"])
    vec = vec.at[_R_W4:_R_W4 + H3, :N_OUT].set(head["w4"].T)
    return w1, w23, vec


def make_dropout_slab(key, batch):
    """Per-layer dropout scale factors (0 or 1/(1-p)), packed lane-aligned."""
    scale = 1.0 / (1.0 - P_DROP)
    k1, k2, k3 = jax.random.split(key, 3)
    slab = jnp.zeros((batch, _D_COLS), jnp.float32)
    for k, off, n in ((k1, _D_OFF1, H1), (k2, _D_OFF2, H2), (k3, _D_OFF3, H3)):
        keep = jax.random.bernoulli(k, 1.0 - P_DROP, (batch, n))
        slab = slab.at[:, off:off + n].set(keep.astype(jnp.float32) * scale)
    return slab


def head_forward(att_flat, w1, w23, vec, drop_slab):
    """Run the fused Pallas classification head on flattened attention feats."""
    batch, k_flat = att_flat.shape
    k_pad = w1.shape[0]
    x = jnp.pad(att_flat.astype(jnp.float32), ((0, 0), (0, k_pad - k_flat)))

    vmem = pl.BlockSpec(memory_space=pltpu.MemorySpace.VMEM)
    out = pl.pallas_call(
        _head_kernel,
        out_shape=jax.ShapeDtypeStruct((batch, OUT_PAD), jnp.float32),
        in_specs=[vmem] * 5,
        out_specs=vmem,
    )(x, w1, w23, vec, drop_slab)
    return out[:, :N_OUT]


# =============================================================================
# Attention front-end (plain JAX): only the parts that reach the output.
# (The fc/bn tails inside the attention sub-modules are computed-then-discarded
#  by the PyTorch forward, so they are omitted.)
# =============================================================================
def _linear(x, w):                                   # nn.Linear, bias=False
    return jnp.einsum("bnd,od->bno", x, w)


def _split_heads(t, nh):
    b, n, d = t.shape
    return t.reshape(b, n, nh, d // nh).transpose(0, 2, 1, 3)


def _merge_heads(t):
    b, nh, n, dh = t.shape
    return t.transpose(0, 2, 1, 3).reshape(b, n, nh * dh)


def _layer_norm(x, gamma, beta):
    mu = jnp.mean(x, axis=-1, keepdims=True)
    var = jnp.mean((x - mu) ** 2, axis=-1, keepdims=True)
    return (x - mu) * jax.lax.rsqrt(var + LN_EPS) * gamma + beta


def _dropout(x, p, key):
    keep = jax.random.bernoulli(key, 1.0 - p, x.shape)
    return jnp.where(keep, x / (1.0 - p), 0.0)


def _mhsa_attention(x, w, nh):
    """MultiHeadSelfAttention.forward's returned `result` (= raw attention)."""
    q = _split_heads(_linear(x, w["wq"]), nh)
    k = _split_heads(_linear(x, w["wk"]), nh)
    v = _split_heads(_linear(x, w["wv"]), nh)
    dist = jnp.einsum("bhqd,bhkd->bhqk", q, k) / sqrt(q.shape[-1])
    dist = jax.nn.softmax(dist, axis=-1)
    return _merge_heads(jnp.einsum("bhqk,bhkd->bhqd", dist, v))


def _mhsal_forward(x, p, nh, key):
    """MultiHeadSelfAttentionLayers.forward (returns the pre-flatten `result`)."""
    k1, k2, k3 = jax.random.split(key, 3)
    h = _mhsa_attention(x, p["mhsa1"], nh)
    h = _dropout(_layer_norm(h, p["ln_g"], p["ln_b"]), P_DROP_ATT, k1)
    res = h
    h = _mhsa_attention(h, p["mhsa2"], nh)
    h = _dropout(_layer_norm(h + res, p["ln_g"], p["ln_b"]), P_DROP_ATT, k2)
    res = h
    h = _mhsa_attention(h, p["mhsa3"], nh)
    h = _dropout(_layer_norm(h + res, p["ln_g"], p["ln_b"]), P_DROP_ATT, k3)
    return h


def _mhcsa_attention(x, y, w, nh):
    """MultiHeadCrossSelfAttention.forward's returned `result` (flattened)."""
    q = _split_heads(_linear(x, w["wq"]), nh)
    k = _split_heads(_linear(y, w["wk"]), nh)
    v = _split_heads(_linear(y, w["wv"]), nh)
    dist = jnp.einsum("bhqd,bhkd->bhqk", q, k) / sqrt(q.shape[-1])
    dist = jax.nn.softmax(dist, axis=-1)
    att = q + jnp.einsum("bhqk,bhkd->bhqd", dist, v)
    att = _merge_heads(att)
    return att.reshape(att.shape[0], -1)


def cross_attention_network_forward(x, y, params, head_operands, key,
                                    num_heads=6):
    kx, ky, kd = jax.random.split(key, 3)
    hx = _mhsal_forward(x, params["mhsal_x"], num_heads, kx)    # (B, Lx, dv)
    hy = _mhsal_forward(y, params["mhsal_y"], num_heads, ky)    # (B, Ly, dv)
    att = _mhcsa_attention(hx, hy, params["mhcsa"], num_heads)  # (B, Lx*dv)
    drop_slab = make_dropout_slab(kd, att.shape[0])
    w1, w23, vec = head_operands
    logits = head_forward(att, w1, w23, vec, drop_slab)         # (B, 2)
    return logits, att, drop_slab


# =============================================================================
# Parameter init (PyTorch-Linear-style uniform bounds) and a pure-JAX
# reference for the fused head (identical bf16 cast points).
# =============================================================================
def _uniform(key, shape, bound):
    return jax.random.uniform(key, shape, jnp.float32, -bound, bound)


def init_params(key, *, length_x, length_y, dim_in_x, dim_in_y, dim_k, dim_v):
    keys = iter(jax.random.split(key, 64))

    def linear_w(out_f, in_f):
        return _uniform(next(keys), (out_f, in_f), 1.0 / sqrt(in_f))

    def linear_wb(out_f, in_f):
        b = 1.0 / sqrt(in_f)
        return (_uniform(next(keys), (out_f, in_f), b),
                _uniform(next(keys), (out_f,), b))

    def mhsa(in_f):
        return {"wq": linear_w(dim_k, in_f),
                "wk": linear_w(dim_k, in_f),
                "wv": linear_w(dim_v, in_f)}

    def mhsal(in_f):
        return {"mhsa1": mhsa(in_f), "mhsa2": mhsa(dim_v), "mhsa3": mhsa(dim_v),
                "ln_g": jnp.ones((dim_k,), jnp.float32),
                "ln_b": jnp.zeros((dim_k,), jnp.float32)}

    k_flat = dim_v * length_x
    w1, b1 = linear_wb(H1, k_flat)
    w2, b2 = linear_wb(H2, H1)
    w3, b3 = linear_wb(H3, H2)
    w4, b4 = linear_wb(N_OUT, H3)
    head = {"w1": w1, "b1": b1, "w2": w2, "b2": b2, "w3": w3, "b3": b3,
            "w4": w4, "b4": b4,
            "g1": jnp.ones((H1,), jnp.float32), "be1": jnp.zeros((H1,), jnp.float32),
            "g2": jnp.ones((H2,), jnp.float32), "be2": jnp.zeros((H2,), jnp.float32),
            "g3": jnp.ones((H3,), jnp.float32), "be3": jnp.zeros((H3,), jnp.float32)}

    return {"mhsal_x": mhsal(dim_in_x),
            "mhsal_y": mhsal(dim_in_y),
            # CrossAttentionNetwork builds MHCSA with dim_in_x = dim_in_y = dim_k
            "mhcsa": mhsa(dim_k),
            "head": head}


def head_reference(att_flat, head, drop_slab):
    """Plain-JAX head with the same bf16 cast points as the Pallas kernel."""
    def bn(h, g, b):
        m = jnp.mean(h, axis=0, keepdims=True)
        v = jnp.mean((h - m) ** 2, axis=0, keepdims=True)
        return g * (h - m) * jax.lax.rsqrt(v + BN_EPS) + b

    h = jnp.dot(att_flat.astype(jnp.bfloat16), head["w1"].T.astype(jnp.bfloat16),
                preferred_element_type=jnp.float32)
    h = jnp.maximum(h + head["b1"], 0.0)
    h = bn(h, head["g1"], head["be1"]) * drop_slab[:, _D_OFF1:_D_OFF1 + H1]
    h = jnp.dot(h.astype(jnp.bfloat16), head["w2"].T.astype(jnp.bfloat16),
                preferred_element_type=jnp.float32)
    h = jnp.maximum(h + head["b2"], 0.0)
    h = bn(h, head["g2"], head["be2"]) * drop_slab[:, _D_OFF2:_D_OFF2 + H2]
    h = jnp.dot(h.astype(jnp.bfloat16), head["w3"].T.astype(jnp.bfloat16),
                preferred_element_type=jnp.float32)
    h = jnp.maximum(h + head["b3"], 0.0)
    h = bn(h, head["g3"], head["be3"]) * drop_slab[:, _D_OFF3:_D_OFF3 + H3]
    return jnp.dot(h, head["w4"].T) + head["b4"]


# =============================================================================
if __name__ == "__main__":
    # Small shapes consistent with the module.  Note: the module's global
    # dim_k = dim_v = 80 is not divisible by the default num_heads = 6 (the
    # PyTorch constructor would assert), so the demo uses 48 (= 6 * 8).
    NUM_HEADS = 6
    DIM_K = DIM_V = 48
    LENGTH_X, LENGTH_Y = 4, 6
    DIM_IN_X, DIM_IN_Y = 64, 48
    BATCH = 8                    # BatchNorm1d (training mode) needs batch > 1

    root = jax.random.PRNGKey(0)
    k_param, k_x, k_y, k_drop = jax.random.split(root, 4)

    params = init_params(k_param, length_x=LENGTH_X, length_y=LENGTH_Y,
                         dim_in_x=DIM_IN_X, dim_in_y=DIM_IN_Y,
                         dim_k=DIM_K, dim_v=DIM_V)
    head_ops = pack_head_operands(params["head"], DIM_V * LENGTH_X)

    x = jax.random.normal(k_x, (BATCH, LENGTH_X, DIM_IN_X), jnp.float32)
    y = jax.random.normal(k_y, (BATCH, LENGTH_Y, DIM_IN_Y), jnp.float32)

    logits, att, drop_slab = cross_attention_network_forward(
        x, y, params, head_ops, k_drop, num_heads=NUM_HEADS)
    logits = jax.block_until_ready(logits)

    assert logits.shape == (BATCH, N_OUT) and logits.dtype == jnp.float32
    assert bool(jnp.all(jnp.isfinite(logits)))

    # Cross-check the fused Pallas head against the plain-JAX reference.
    ref = head_reference(att, params["head"], drop_slab)
    assert bool(jnp.allclose(logits, ref, atol=1e-2, rtol=1e-2))

    print("KERNEL_OK")
</pallas_src>

<mosaic_0001>
module attributes {stable_mosaic.version = 11 : i64} {
  func.func @_head_kernel(%arg0: memref<8x256xf32, #tpu.memory_space<vmem>>, %arg1: memref<256x192xbf16, #tpu.memory_space<vmem>>, %arg2: memref<224x128xbf16, #tpu.memory_space<vmem>>, %arg3: memref<88x256xf32, #tpu.memory_space<vmem>>, %arg4: memref<8x512xf32, #tpu.memory_space<vmem>>, %arg5: memref<8x128xf32, #tpu.memory_space<vmem>>) attributes {dimension_semantics = [], scalar_prefetch = 0 : i64, scratch_operands = 0 : i64, tpu.core_type = #tpu.core_type<tc>} {
    %c0 = arith.constant 0 : index
    %c0_0 = arith.constant 0 : index
    %0 = vector.load %arg0[%c0, %c0_0] : memref<8x256xf32, #tpu.memory_space<vmem>>, vector<8x256xf32>
    %1 = arith.truncf %0 : vector<8x256xf32> to vector<8x256xbf16>
    %c0_1 = arith.constant 0 : index
    %c0_2 = arith.constant 0 : index
    %2 = vector.load %arg1[%c0_1, %c0_2] : memref<256x192xbf16, #tpu.memory_space<vmem>>, vector<256x192xbf16>
    %cst = arith.constant dense<0.000000e+00> : vector<8x192xf32>
    %3 = tpu.matmul %1, %2, %cst {dimension_numbers = #tpu.dot_dimension_numbers<[1], [0], [0], [1], [0, 0, 1, 1], [], []>} : vector<8x256xbf16>, vector<256x192xbf16>, vector<8x192xf32> -> vector<8x192xf32>
    %c0_3 = arith.constant 0 : index
    %c0_4 = arith.constant 0 : index
    %4 = vector.load %arg3[%c0_3, %c0_4] : memref<88x256xf32, #tpu.memory_space<vmem>>, vector<1x192xf32>
    %5 = vector.broadcast %4 : vector<1x192xf32> to vector<8x192xf32>
    %6 = arith.addf %3, %5 : vector<8x192xf32>
    %cst_5 = arith.constant 0.000000e+00 : f32
    %7 = vector.broadcast %cst_5 : f32 to vector<8x192xf32>
    %8 = arith.maximumf %6, %7 : vector<8x192xf32>
    %c8 = arith.constant 8 : index
    %c0_6 = arith.constant 0 : index
    %9 = vector.load %arg3[%c8, %c0_6] : memref<88x256xf32, #tpu.memory_space<vmem>>, vector<1x192xf32>
    %c16 = arith.constant 16 : index
    %c0_7 = arith.constant 0 : index
    %10 = vector.load %arg3[%c16, %c0_7] : memref<88x256xf32, #tpu.memory_space<vmem>>, vector<1x192xf32>
    %cst_8 = arith.constant dense<0.000000e+00> : vector<192xf32>
    %11 = vector.multi_reduction <add>, %8, %cst_8 [0] : vector<8x192xf32> to vector<192xf32>
    %12 = vector.shape_cast %11 : vector<192xf32> to vector<1x192xf32>
    %cst_9 = arith.constant 8.000000e+00 : f32
    %13 = vector.broadcast %cst_9 : f32 to vector<1x192xf32>
    %14 = arith.divf %12, %13 : vector<1x192xf32>
    %15 = vector.broadcast %14 : vector<1x192xf32> to vector<8x192xf32>
    %16 = arith.subf %8, %15 : vector<8x192xf32>
    %17 = arith.mulf %16, %16 : vector<8x192xf32>
    %cst_10 = arith.constant dense<0.000000e+00> : vector<192xf32>
    %18 = vector.multi_reduction <add>, %17, %cst_10 [0] : vector<8x192xf32> to vector<192xf32>
    %19 = vector.shape_cast %18 : vector<192xf32> to vector<1x192xf32>
    %cst_11 = arith.constant 8.000000e+00 : f32
    %20 = vector.broadcast %cst_11 : f32 to vector<1x192xf32>
    %21 = arith.divf %19, %20 : vector<1x192xf32>
    %22 = vector.broadcast %14 : vector<1x192xf32> to vector<8x192xf32>
    %23 = arith.subf %8, %22 : vector<8x192xf32>
    %24 = vector.broadcast %9 : vector<1x192xf32> to vector<8x192xf32>
    %25 = arith.mulf %24, %23 : vector<8x192xf32>
    %cst_12 = arith.constant 9.99999974E-6 : f32
    %26 = vector.broadcast %cst_12 : f32 to vector<1x192xf32>
    %27 = arith.addf %21, %26 : vector<1x192xf32>
    %28 = math.rsqrt %27 : vector<1x192xf32>
    %29 = vector.broadcast %28 : vector<1x192xf32> to vector<8x192xf32>
    %30 = arith.mulf %25, %29 : vector<8x192xf32>
    %31 = vector.broadcast %10 : vector<1x192xf32> to vector<8x192xf32>
    %32 = arith.addf %30, %31 : vector<8x192xf32>
    %c0_13 = arith.constant 0 : index
    %c0_14 = arith.constant 0 : index
    %33 = vector.load %arg4[%c0_13, %c0_14] : memref<8x512xf32, #tpu.memory_space<vmem>>, vector<8x192xf32>
    %34 = arith.mulf %32, %33 : vector<8x192xf32>
    %35 = arith.truncf %34 : vector<8x192xf32> to vector<8x192xbf16>
    %c0_15 = arith.constant 0 : index
    %c0_16 = arith.constant 0 : index
    %36 = vector.load %arg2[%c0_15, %c0_16] : memref<224x128xbf16, #tpu.memory_space<vmem>>, vector<192x32xbf16>
    %cst_17 = arith.constant dense<0.000000e+00> : vector<8x32xf32>
    %37 = tpu.matmul %35, %36, %cst_17 {dimension_numbers = #tpu.dot_dimension_numbers<[1], [0], [0], [1], [0, 0, 1, 1], [], []>} : vector<8x192xbf16>, vector<192x32xbf16>, vector<8x32xf32> -> vector<8x32xf32>
    %c24 = arith.constant 24 : index
    %c0_18 = arith.constant 0 : index
    %38 = vector.load %arg3[%c24, %c0_18] : memref<88x256xf32, #tpu.memory_space<vmem>>, vector<1x32xf32>
    %39 = vector.broadcast %38 : vector<1x32xf32> to vector<8x32xf32>
    %40 = arith.addf %37, %39 : vector<8x32xf32>
    %cst_19 = arith.constant 0.000000e+00 : f32
    %41 = vector.broadcast %cst_19 : f32 to vector<8x32xf32>
    %42 = arith.maximumf %40, %41 : vector<8x32xf32>
    %c32 = arith.constant 32 : index
    %c0_20 = arith.constant 0 : index
    %43 = vector.load %arg3[%c32, %c0_20] : memref<88x256xf32, #tpu.memory_space<vmem>>, vector<1x32xf32>
    %c40 = arith.constant 40 : index
    %c0_21 = arith.constant 0 : index
    %44 = vector.load %arg3[%c40, %c0_21] : memref<88x256xf32, #tpu.memory_space<vmem>>, vector<1x32xf32>
    %cst_22 = arith.constant dense<0.000000e+00> : vector<32xf32>
    %45 = vector.multi_reduction <add>, %42, %cst_22 [0] : vector<8x32xf32> to vector<32xf32>
    %46 = vector.shape_cast %45 : vector<32xf32> to vector<1x32xf32>
    %cst_23 = arith.constant 8.000000e+00 : f32
    %47 = vector.broadcast %cst_23 : f32 to vector<1x32xf32>
    %48 = arith.divf %46, %47 : vector<1x32xf32>
    %49 = vector.broadcast %48 : vector<1x32xf32> to vector<8x32xf32>
    %50 = arith.subf %42, %49 : vector<8x32xf32>
    %51 = arith.mulf %50, %50 : vector<8x32xf32>
    %cst_24 = arith.constant dense<0.000000e+00> : vector<32xf32>
    %52 = vector.multi_reduction <add>, %51, %cst_24 [0] : vector<8x32xf32> to vector<32xf32>
    %53 = vector.shape_cast %52 : vector<32xf32> to vector<1x32xf32>
    %cst_25 = arith.constant 8.000000e+00 : f32
    %54 = vector.broadcast %cst_25 : f32 to vector<1x32xf32>
    %55 = arith.divf %53, %54 : vector<1x32xf32>
    %56 = vector.broadcast %48 : vector<1x32xf32> to vector<8x32xf32>
    %57 = arith.subf %42, %56 : vector<8x32xf32>
    %58 = vector.broadcast %43 : vector<1x32xf32> to vector<8x32xf32>
    %59 = arith.mulf %58, %57 : vector<8x32xf32>
    %cst_26 = arith.constant 9.99999974E-6 : f32
    %60 = vector.broadcast %cst_26 : f32 to vector<1x32xf32>
    %61 = arith.addf %55, %60 : vector<1x32xf32>
    %62 = math.rsqrt %61 : vector<1x32xf32>
    %63 = vector.broadcast %62 : vector<1x32xf32> to vector<8x32xf32>
    %64 = arith.mulf %59, %63 : vector<8x32xf32>
    %65 = vector.broadcast %44 : vector<1x32xf32> to vector<8x32xf32>
    %66 = arith.addf %64, %65 : vector<8x32xf32>
    %c0_27 = arith.constant 0 : index
    %c256 = arith.constant 256 : index
    %67 = vector.load %arg4[%c0_27, %c256] : memref<8x512xf32, #tpu.memory_space<vmem>>, vector<8x32xf32>
    %68 = arith.mulf %66, %67 : vector<8x32xf32>
    %69 = arith.truncf %68 : vector<8x32xf32> to vector<8x32xbf16>
    %c192 = arith.constant 192 : index
    %c0_28 = arith.constant 0 : index
    %70 = vector.load %arg2[%c192, %c0_28] : memref<224x128xbf16, #tpu.memory_space<vmem>>, vector<32x8xbf16>
    %cst_29 = arith.constant dense<0.000000e+00> : vector<8x8xf32>
    %71 = tpu.matmul %69, %70, %cst_29 {dimension_numbers = #tpu.dot_dimension_numbers<[1], [0], [0], [1], [0, 0, 1, 1], [], []>} : vector<8x32xbf16>, vector<32x8xbf16>, vector<8x8xf32> -> vector<8x8xf32>
    %c48 = arith.constant 48 : index
    %c0_30 = arith.constant 0 : index
    %72 = vector.load %arg3[%c48, %c0_30] : memref<88x256xf32, #tpu.memory_space<vmem>>, vector<1x8xf32>
    %73 = vector.broadcast %72 : vector<1x8xf32> to vector<8x8xf32>
    %74 = arith.addf %71, %73 : vector<8x8xf32>
    %cst_31 = arith.constant 0.000000e+00 : f32
    %75 = vector.broadcast %cst_31 : f32 to vector<8x8xf32>
    %76 = arith.maximumf %74, %75 : vector<8x8xf32>
    %c56 = arith.constant 56 : index
    %c0_32 = arith.constant 0 : index
    %77 = vector.load %arg3[%c56, %c0_32] : memref<88x256xf32, #tpu.memory_space<vmem>>, vector<1x8xf32>
    %c64 = arith.constant 64 : index
    %c0_33 = arith.constant 0 : index
    %78 = vector.load %arg3[%c64, %c0_33] : memref<88x256xf32, #tpu.memory_space<vmem>>, vector<1x8xf32>
    %cst_34 = arith.constant dense<0.000000e+00> : vector<8xf32>
    %79 = vector.multi_reduction <add>, %76, %cst_34 [0] : vector<8x8xf32> to vector<8xf32>
    %80 = vector.shape_cast %79 : vector<8xf32> to vector<1x8xf32>
    %cst_35 = arith.constant 8.000000e+00 : f32
    %81 = vector.broadcast %cst_35 : f32 to vector<1x8xf32>
    %82 = arith.divf %80, %81 : vector<1x8xf32>
    %83 = vector.broadcast %82 : vector<1x8xf32> to vector<8x8xf32>
    %84 = arith.subf %76, %83 : vector<8x8xf32>
    %85 = arith.mulf %84, %84 : vector<8x8xf32>
    %cst_36 = arith.constant dense<0.000000e+00> : vector<8xf32>
    %86 = vector.multi_reduction <add>, %85, %cst_36 [0] : vector<8x8xf32> to vector<8xf32>
    %87 = vector.shape_cast %86 : vector<8xf32> to vector<1x8xf32>
    %cst_37 = arith.constant 8.000000e+00 : f32
    %88 = vector.broadcast %cst_37 : f32 to vector<1x8xf32>
    %89 = arith.divf %87, %88 : vector<1x8xf32>
    %90 = vector.broadcast %82 : vector<1x8xf32> to vector<8x8xf32>
    %91 = arith.subf %76, %90 : vector<8x8xf32>
    %92 = vector.broadcast %77 : vector<1x8xf32> to vector<8x8xf32>
    %93 = arith.mulf %92, %91 : vector<8x8xf32>
    %cst_38 = arith.constant 9.99999974E-6 : f32
    %94 = vector.broadcast %cst_38 : f32 to vector<1x8xf32>
    %95 = arith.addf %89, %94 : vector<1x8xf32>
    %96 = math.rsqrt %95 : vector<1x8xf32>
    %97 = vector.broadcast %96 : vector<1x8xf32> to vector<8x8xf32>
    %98 = arith.mulf %93, %97 : vector<8x8xf32>
    %99 = vector.broadcast %78 : vector<1x8xf32> to vector<8x8xf32>
    %100 = arith.addf %98, %99 : vector<8x8xf32>
    %c0_39 = arith.constant 0 : index
    %c384 = arith.constant 384 : index
    %101 = vector.load %arg4[%c0_39, %c384] : memref<8x512xf32, #tpu.memory_space<vmem>>, vector<8x8xf32>
    %102 = arith.mulf %100, %101 : vector<8x8xf32>
    %c80 = arith.constant 80 : index
    %c0_40 = arith.constant 0 : index
    %103 = vector.load %arg3[%c80, %c0_40] : memref<88x256xf32, #tpu.memory_space<vmem>>, vector<8x128xf32>
    %cst_41 = arith.constant dense<0.000000e+00> : vector<8x128xf32>
    %104 = tpu.matmul %102, %103, %cst_41 {dimension_numbers = #tpu.dot_dimension_numbers<[1], [0], [0], [1], [0, 0, 1, 1], [], []>} : vector<8x8xf32>, vector<8x128xf32>, vector<8x128xf32> -> vector<8x128xf32>
    %c72 = arith.constant 72 : index
    %c0_42 = arith.constant 0 : index
    %105 = vector.load %arg3[%c72, %c0_42] : memref<88x256xf32, #tpu.memory_space<vmem>>, vector<1x128xf32>
    %106 = vector.broadcast %105 : vector<1x128xf32> to vector<8x128xf32>
    %107 = arith.addf %104, %106 : vector<8x128xf32>
    %c0_43 = arith.constant 0 : index
    %c0_44 = arith.constant 0 : index
    %108 = vector.load %arg5[%c0_43, %c0_44] : memref<8x128xf32, #tpu.memory_space<vmem>>, vector<8x128xf32>
    tpu.vector_store %arg5[%c0_43, %c0_44], %107 {strides = array<i32>} : memref<8x128xf32, #tpu.memory_space<vmem>>, vector<8x128xf32>,
    return
  }
}

</mosaic_0001>

<bundles_post_ra>
// kernel: tpu_custom_call.1
= control target key start
LH: loop header
LB: loop body
LE: loop exit
PB: predicated region body
PF: predicated region fallthrough
CT: control target
= control target key end

     0   :  { %s1112_s0 = inlined_call_operand.vmem [shape: f32[8,256], index: 0, kind: input, shape index: {}]   ;;  %s1113_s1 = inlined_call_operand.vmem [shape: bf16[256,192], index: 1, kind: input, shape index: {}]   ;;  %s1114_s2 = inlined_call_operand.vmem [shape: bf16[224,128], index: 2, kind: input, shape index: {}]   ;;  %s1115_s3 = inlined_call_operand.vmem [shape: f32[88,256], index: 3, kind: input, shape index: {}]   ;;  %s1116_s4 = inlined_call_operand.vmem [shape: f32[8,512], index: 4, kind: input, shape index: {}]   ;;  %s1117_s5 = inlined_call_operand.hbm [shape: f32[8,128], index: 5, kind: output, shape index: {}]  }
   0x1   :  { %v773_v0 = vld [vmem:[%s1113_s1 + $0x74] ss:$8 sps:$4 sm:$0xff]   ;;  %v775_v1 = vld [vmem:[%s1113_s1 + $0x70] ss:$8 sps:$4 sm:$0xff]   ;;  %v776_v2 = vld [vmem:[%s1113_s1 + $0x64] ss:$8 sps:$4 sm:$0xff]  }
   0x2   :  { %230 = vmatprep.subr.bf16.mxu0 %v773_v0  ;;  %v778_v3 = vld [vmem:[%s1113_s1 + $0x60] ss:$8 sps:$4 sm:$0xff]   ;;  %v779_v4 = vld [vmem:[%s1113_s1 + $0x54] ss:$8 sps:$4 sm:$0xff]   ;;  %v781_v5 = vld [vmem:[%s1113_s1 + $0x50] ss:$8 sps:$4 sm:$0xff]  }
   0x3   :  { %231 = vmatpush1.bf16.msra.mxu0 %v775_v1  ;;  %v782_v6 = vld [vmem:[%s1113_s1 + $0x44] ss:$8 sps:$4 sm:$0xff]   ;;  %v784_v7 = vld [vmem:[%s1113_s1 + $0x40] ss:$8 sps:$4 sm:$0xff]   ;;  %v785_v8 = vld [vmem:[%s1113_s1 + $0x34] ss:$8 sps:$4 sm:$0xff]  }
   0x4   :  { %232 = vmatprep.subr.bf16.mxu0 %v776_v2  ;;  %v787_v9 = vld [vmem:[%s1113_s1 + $0x30] ss:$8 sps:$4 sm:$0xff]   ;;  %v788_v10 = vld [vmem:[%s1113_s1 + $0x24] ss:$8 sps:$4 sm:$0xff]   ;;  %v790_v11 = vld [vmem:[%s1113_s1 + $0x20] ss:$8 sps:$4 sm:$0xff]  }
   0x5   :  { %v791_v12 = vld [vmem:[%s1113_s1 + $0x14] ss:$8 sps:$4 sm:$0xff]   ;;  %v23_v13 = vld [vmem:[%s1112_s0 + $0x8] sm:$0xff]  ;;  %v793_v14 = vld [vmem:[%s1113_s1 + $0x10] ss:$8 sps:$4 sm:$0xff]  }
   0x6   :  { %v794_v15 = vld [vmem:[%s1113_s1 + $0x4] ss:$8 sps:$4 sm:$0xff]   ;;  %v25_v16 = vpack.c.bf16 %v23_v13, %v23_v13  ;;  %v796_v17 = vld [vmem:[%s1113_s1] ss:$8 sps:$4 sm:$0xff]   ;;  %v797_v18 = vld [vmem:[%s1113_s1 + $0xf4] ss:$8 sps:$4 sm:$0xff]  }
   0x7   :  { %233 = vmatpush1.bf16.msra.mxu0 %v778_v3  ;;  %v799_v19 = vld [vmem:[%s1113_s1 + $0xf0] ss:$8 sps:$4 sm:$0xff]   ;;  %v800_v20 = vld [vmem:[%s1113_s1 + $0xe4] ss:$8 sps:$4 sm:$0xff]  }
   0x8   :  { %234 = vmatprep.subr.bf16.mxu0 %v779_v4  ;;  %262 = vmatprep.mubr.bf16.mxu0 %v25_v16 }
   0xb   :  { %235 = vmatpush1.bf16.msra.mxu0 %v781_v5 }
   0xc   :  { %236 = vmatprep.subr.bf16.mxu0 %v782_v6 }
   0xf   :  { %237 = vmatpush1.bf16.msra.mxu0 %v784_v7 }
  0x10   :  { %238 = vmatprep.subr.bf16.mxu0 %v785_v8 }
  0x13   :  { %239 = vmatpush1.bf16.msra.mxu0 %v787_v9 }
  0x14   :  { %240 = vmatprep.subr.bf16.mxu0 %v788_v10 }
  0x17   :  { %241 = vmatpush1.bf16.msra.mxu0 %v790_v11 }
  0x18   :  { %242 = vmatprep.subr.bf16.mxu0 %v791_v12 }
  0x1b   :  { %243 = vmatpush1.bf16.msra.mxu0 %v793_v14 }
  0x1c   :  { %244 = vmatprep.subr.bf16.mxu0 %v794_v15 }
  0x1f   :  { %245 = vmatpush1.bf16.msra.mxu0 %v796_v17 }
  0x20   :  { %246 = vmatprep.subr.bf16.mxu0 %v797_v18 }
  0x21   :  { %10 = vsyncpa [#allocation3], 0  ;;  %v802_v21 = vld [vmem:[%s1113_s1 + $0xe0] ss:$8 sps:$4 sm:$0xff]   ;;  %v803_v22 = vld [vmem:[%s1113_s1 + $0xd4] ss:$8 sps:$4 sm:$0xff]   ;;  %v60_v49 = vlaneseq }
  0x22   :  { %v805_v23 = vld [vmem:[%s1113_s1 + $0xd0] ss:$8 sps:$4 sm:$0xff]   ;;  %v806_v24 = vld [vmem:[%s1113_s1 + $0xc4] ss:$8 sps:$4 sm:$0xff]   ;;  %v808_v25 = vld [vmem:[%s1113_s1 + $0xc0] ss:$8 sps:$4 sm:$0xff]  }
  0x23   :  { %247 = vmatpush2.bf16.msra.mxu0 %v799_v19  ;;  %v809_v26 = vld [vmem:[%s1113_s1 + $0xb4] ss:$8 sps:$4 sm:$0xff]   ;;  %v811_v27 = vld [vmem:[%s1113_s1 + $0xb0] ss:$8 sps:$4 sm:$0xff]   ;;  %v812_v28 = vld [vmem:[%s1113_s1 + $0xa4] ss:$8 sps:$4 sm:$0xff]  }
  0x24   :  { %248 = vmatprep.subr.bf16.mxu0 %v800_v20  ;;  %v814_v29 = vld [vmem:[%s1113_s1 + $0xa0] ss:$8 sps:$4 sm:$0xff]   ;;  %v815_v30 = vld [vmem:[%s1113_s1 + $0x94] ss:$8 sps:$4 sm:$0xff]   ;;  %v817_v31 = vld [vmem:[%s1113_s1 + $0x90] ss:$8 sps:$4 sm:$0xff]  }
  0x25   :  { %v818_v32 = vld [vmem:[%s1113_s1 + $0x84] ss:$8 sps:$4 sm:$0xff]   ;;  %v820_v33 = vld [vmem:[%s1113_s1 + $0x80] ss:$8 sps:$4 sm:$0xff]   ;;  %v821_v36 = vld [vmem:[%s1114_s2 + $0x38] sm:$0xff]   ;;  %v865_v37 = vmov 0  }
  0x26   :  { %v22_v34 = vld [vmem:[%s1112_s0] sm:$0xff]  ;;  %451 = vmatprep.subr.bf16.mxu1 %v865_v37  ;;  %v822_v38 = vld [vmem:[%s1114_s2 + $0x30] sm:$0xff]   ;;  %v823_v39 = vld [vmem:[%s1114_s2 + $0x28] sm:$0xff]   ;;  %v61_v50 = vshrl.u32 %v60_v49, 7  ;;  %vm283_vm0 = vcmask 523264   ;;  %vm867_vm1 = vmmov 0  }
  0x27   :  { %249 = vmatpush2.bf16.msra.mxu0 %v802_v21  ;;  %v24_v35 = vpack.c.bf16 %v22_v34, %v22_v34  ;;  %452 = vmatpush1.bf16.msra.mxu1 %v821_v36  ;;  %v824_v40 = vld [vmem:[%s1114_s2 + $0x20] sm:$0xff]   ;;  %v825_v41 = vld [vmem:[%s1114_s2 + $0x18] sm:$0xff]   ;;  %v826_v42 = vld [vmem:[%s1114_s2 + $0x10] sm:$0xff]   ;;  %vm494_vm2 = vcmask 261120   ;;  %vm584_vm3 = vcmask 64512   ;;  %s868_s14 = smov [#allocation2]  }
  0x28   :  { %250 = vmatprep.subr.bf16.mxu0 %v803_v22  ;;  %453 = vmatprep.subr.bf16.mxu1 %v865_v37  ;;  %v827_v43 = vld [vmem:[%s1114_s2 + $0x8] sm:$0xff]   ;;  %v828_v44 = vld [vmem:[%s1114_s2] sm:$0xff]   ;;  %v829_v45 = vld [vmem:[%s1114_s2 + $0x58] sm:$0xff]   ;;  %v1037_v51 = vsub.s32 0, %v61_v50  ;;  %v1042_v53 = vsub.s32 1, %v61_v50  ;;  %s692_s1 = sshll.u32 %s868_s14, 4  ;;  %s693_s1 = int_to_ptr.vmem [resolvable:$true] %s692_s1 }
  0x29   :  { %v830_v46 = vld [vmem:[%s1114_s2 + $0x50] sm:$0xff]   ;;  %v831_v47 = vld [vmem:[%s1114_s2 + $0x48] sm:$0xff]   ;;  %v832_v48 = vld [vmem:[%s1114_s2 + $0x40] sm:$0xff]   ;;  %s843_s0 = scalar_lea.vmem %s693_s1, 128  ;;  %p848_p1 = scmp.lt.s32.totalorder %s693_s1, %s693_s1 }
  0x2a   :  { %v58_v52 = vld [vmem:[%s1115_s3] ss:$8 sm:$0x3]  ;;  %v732_v36 = vld [vmem:[%s1115_s3 + $0x10] ss:$8 sm:$0x3]  ;;  %p844_p0 = scmp.ne.s32.totalorder %s693_s1, %s843_s0  ;;  %p849_p2 = scmp.lt.s32.totalorder %s843_s0, %s843_s0 }
  0x2b   :  { %251 = vmatpush2.bf16.msra.mxu0 %v805_v23  ;;  %454 = vmatpush1.bf16.msra.mxu1 %v822_v38  ;;  %v63_v54 = vrot.slane %v58_v52, %v1037_v51  ;;  %v67_v55 = vrot.slane %v58_v52, %v1042_v53  ;;  %v733_v38 = vld [vmem:[%s1115_s3 + $0x20] ss:$8 sm:$0x3] }
  0x2c   :  { %252 = vmatprep.subr.bf16.mxu0 %v806_v24  ;;  %455 = vmatprep.subr.bf16.mxu1 %v865_v37  ;;  %v345_v49 = vld [vmem:[%s1116_s4] sm:$0xff]  ;;  %v346_v50 = vld [vmem:[%s1116_s4 + $0x8] sm:$0xff]  ;;  %p850_p3 = por %p849_p2, %p848_p1 }
  0x2e   :  { %p851_p4 = pnand %p850_p3, %p844_p0 }
  0x2f   :  { %253 = vmatpush2.bf16.msra.mxu0 %v808_v25  ;;  %456 = vmatpush1.bf16.msra.mxu1 %v823_v39 }
  0x30   :  { %254 = vmatprep.subr.bf16.mxu0 %v809_v26  ;;  %457 = vmatprep.subr.bf16.mxu1 %v865_v37 }
  0x33   :  { %255 = vmatpush2.bf16.msra.mxu0 %v811_v27  ;;  %458 = vmatpush1.bf16.msra.mxu1 %v824_v40  ;;  %v321_v40 = vrot.slane %v732_v36, %v1042_v53 }
  0x34   :  { %256 = vmatprep.subr.bf16.mxu0 %v812_v28  ;;  %459 = vmatprep.subr.bf16.mxu1 %v865_v37 }
  0x37   :  { %257 = vmatpush2.bf16.msra.mxu0 %v814_v29  ;;  %460 = vmatpush1.bf16.msra.mxu1 %v825_v41 }
  0x38   :  { %258 = vmatprep.subr.bf16.mxu0 %v815_v30  ;;  %461 = vmatprep.subr.bf16.mxu1 %v865_v37 }
  0x3b   :  { %259 = vmatpush2.bf16.msra.mxu0 %v817_v31  ;;  %462 = vmatpush1.bf16.msra.mxu1 %v826_v42  ;;  %v336_v42 = vrot.slane %v733_v38, %v1037_v51 }
  0x3c   :  { %260 = vmatprep.subr.bf16.mxu0 %v818_v32  ;;  %463 = vmatprep.subr.bf16.mxu1 %v865_v37 }
  0x3f   :  { %261 = vmatpush2.bf16.msra.mxu0 %v820_v33  ;;  %464 = vmatpush1.bf16.msra.mxu1 %v827_v43 }
  0x40   :  { %465 = vmatprep.subr.bf16.mxu1 %v865_v37 }
  0x42   :  { %263 = vmatmul.mubr.bf16.vlgmr.msra.gmra.mxu0 %v24_v35 }
  0x43   :  { %466 = vmatpush1.bf16.msra.mxu1 %v828_v44 }
  0x44   :  { %475 = vmatprep.subr.bf16.mxu1 %v865_v37 }
  0x47   :  { %476 = vmatpush2.bf16.msra.mxu1 %v829_v45  ;;  %v340_v45 = vrot.slane %v733_v38, %v1042_v53  ;;  %v833_v53 = vld [vmem:[%s1114_s2 + $0x68] sm:$0xff]  }
  0x48   :  { %477 = vmatprep.subr.bf16.mxu1 %v865_v37 }
  0x4b   :  { %478 = vmatpush2.bf16.msra.mxu1 %v830_v46 }
  0x4c   :  { %479 = vmatprep.subr.bf16.mxu1 %v865_v37 }
  0x4f   :  { %480 = vmatpush2.bf16.msra.mxu1 %v831_v47 }
  0x50   :  { %481 = vmatprep.subr.bf16.mxu1 %v865_v37  ;;  %v317_v37 = vrot.slane %v732_v36, %v1037_v51 }
  0x53   :  { %482 = vmatpush2.bf16.msra.mxu1 %v832_v48 }
 0x102   :  { %v264_v56 = vpop.f32.mrf.mxu0 }
 0x103   :  { %v265_v57 = vadd.f32 %v264_v56, %v63_v54 }
 0x104   :  { %v266_v58 = vpop.f32.mrf.mxu0 }
 0x105   :  { %v271_v59 = vmax.f32 %v265_v57, 0.0  ;;  %v267_v60 = vadd.f32 %v266_v58, %v67_v55  ;;  %v866_v57 = vmov 0.0   ;;  %v834_v58 = vld [vmem:[%s1114_s2 + $0x60] sm:$0xff]  }
 0x106   :  { %v268_v61 = vpop.f32.mrf.mxu0  ;;  %756 = vmatprep.subr.bf16.mxu1 %v866_v57 }
 0x107   :  { %v277_v62 = vrot.slane %v271_v59, 4  ;;  %v272_v63 = vmax.f32 %v267_v60, 0.0 }
 0x108   :  { %v269_v0 = vpop.f32.mrf.mxu0 }
 0x109   :  { %v278_v1 = vadd.f32 %v277_v62, %v271_v59  ;;  %v284_v2 = vsel %vm283_vm0, %v272_v63, 0.0 }
 0x10a   :  { %v285_v3 = vrot.slane %v284_v2, 4 }
 0x10b   :  { %v279_v4 = vrot.slane %v278_v1, 2 }
 0x10c   :  { %v286_v5 = vadd.f32 %v285_v3, %v284_v2 }
 0x10d   :  { %v280_v6 = vadd.f32 %v279_v4, %v278_v1 }
 0x10e   :  { %v287_v7 = vrot.slane %v286_v5, 2 }
 0x10f   :  { %v281_v8 = vrot.slane %v280_v6, 1 }
 0x110   :  { %v288_v9 = vadd.f32 %v287_v7, %v286_v5 }
 0x111   :  { %v282_v10 = vadd.f32 %v281_v8, %v280_v6 }
 0x112   :  { %v289_v11 = vrot.slane %v288_v9, 1 }
 0x113   :  { %v292_v12 = vmul.f32 0.125, %v282_v10 }
 0x114   :  { %v290_v13 = vadd.f32 %v289_v11, %v288_v9 }
 0x115   :  { %v294_v14 = vsub.f32 %v271_v59, %v292_v12  ;;  %v375_v59 = vld [vmem:[%s1115_s3 + $0x30] ss:$0 sm:$0xff] }
 0x116   :  { %v293_v15 = vmul.f32 0.125, %v290_v13 }
 0x117   :  { %v296_v16 = vmul.f32 %v294_v14, %v294_v14  ;;  %v324_v39 = vmul.f32 %v317_v37, %v294_v14 }
 0x118   :  { %v295_v17 = vsub.f32 %v272_v63, %v293_v15 }
 0x119   :  { %v298_v18 = vrot.slane %v296_v16, 4 }
 0x11a   :  { %v297_v19 = vmul.f32 %v295_v17, %v295_v17  ;;  %v325_v44 = vmul.f32 %v321_v40, %v295_v17 }
 0x11b   :  { %v299_v20 = vadd.f32 %v298_v18, %v296_v16 }
 0x11c   :  { %v304_v21 = vsel %vm283_vm0, %v297_v19, 0.0 }
 0x11d   :  { %v300_v22 = vrot.slane %v299_v20, 2  ;;  %v305_v23 = vrot.slane %v304_v21, 4 }
 0x11f   :  { %v301_v24 = vadd.f32 %v300_v22, %v299_v20  ;;  %v306_v25 = vadd.f32 %v305_v23, %v304_v21  ;;  %v492_v21 = vld [vmem:[%s1115_s3 + $0x40] ss:$0 sm:$0xff] }
 0x121   :  { %v302_v26 = vrot.slane %v301_v24, 1  ;;  %v307_v27 = vrot.slane %v306_v25, 2 }
 0x123   :  { %v303_v28 = vadd.f32 %v302_v26, %v301_v24  ;;  %v308_v29 = vadd.f32 %v307_v27, %v306_v25  ;;  %v493_v24 = vld [vmem:[%s1115_s3 + $0x50] ss:$0 sm:$0xff] }
 0x124   :  { %v518_v26 = vld [vmem:[%s1116_s4 + $0x10] sm:$0xff] }
 0x125   :  { %v311_v30 = vmul.f32 0.125, %v303_v28  ;;  %v309_v31 = vrot.slane %v308_v29, 1 }
 0x127   :  { %v326_v32 = vadd.f32 1e-05, %v311_v30  ;;  %v310_v33 = vadd.f32 %v309_v31, %v308_v29  ;;  %v610_v30 = vld [vmem:[%s1115_s3 + $0xa0] sm:$0xff] }
 0x128   :  { %v525_v31 = vld [vmem:[%s1115_s3 + $0x60] ss:$0 sm:$0xff] }
 0x129   :  { %835 = vrsqrt.f32 %v326_v32  ;;  %v312_v34 = vmul.f32 0.125, %v310_v33 }
 0x12b   :  { %v327_v35 = vadd.f32 1e-05, %v312_v34 }
 0x12d   :  { %837 = vrsqrt.f32 %v327_v35 }
 0x136   :  { %v836_v41 = vpop.eup %835 }
 0x137   :  { %v330_v43 = vmul.f32 %v836_v41, %v324_v39 }
 0x139   :  { %v343_v47 = vadd.f32 %v336_v42, %v330_v43 }
 0x13a   :  { %v838_v46 = vpop.eup %837 }
 0x13b   :  { %v331_v48 = vmul.f32 %v838_v46, %v325_v44  ;;  %v347_v54 = vmul.f32 %v345_v49, %v343_v47 }
 0x13d   :  { %v344_v52 = vadd.f32 %v340_v45, %v331_v48  ;;  %v349_v51 = vpack.c.bf16 %v347_v54, %v347_v54 }
 0x13f   :  { %v348_v55 = vmul.f32 %v346_v50, %v344_v52 }
 0x141   :  { %v350_v56 = vpack.c.bf16 %v348_v55, %v348_v55 }
 0x143   :  { %746 = vmatprep.mubr.msk.bf16.mxu1 %vm283_vm0, %v350_v56 }
 0x144   :  { %484 = vmatmul.mubr.bf16.vlgmr.msra.gmra.mxu1 %v349_v51 }
 0x145   :  { %757 = vmatpush3.bf16.msra.mxu1 %v833_v53  ;;  %760 = vmatprep.mubr.msk.bf16.mxu1 %vm867_vm1, %v866_v57 }
 0x146   :  { %758 = vmatprep.subr.bf16.mxu1 %v866_v57 }
 0x149   :  { %759 = vmatpush3.bf16.msra.mxu1 %v834_v58 }
 0x14a   :  { %764 = vmatprep.subr.mxu1 %v866_v57 }
 0x204   :  { %v485_v60 = vpop.f32.mrf.mxu1 }
 0x205   :  { %v486_v61 = vadd.f32 %v485_v60, %v375_v59  ;;  %v583_v60 = vld [vmem:[%s1115_s3 + $0x80] ss:$0 sm:$0xff] }
 0x206   :  { %v487_v62 = vpop.f32.mrf.mxu1 }
 0x207   :  { %v491_v63 = vmax.f32 %v486_v61, 0.0  ;;  %v608_v62 = vld [vmem:[%s1116_s4 + $0x18] sm:$0xff] }
 0x208   :  { %v488_v0 = vpop.f32.mrf.mxu1 }
 0x209   :  { %v495_v1 = vsel %vm494_vm2, %v491_v63, 0.0 }
 0x20a   :  { %v496_v2 = vrot.slane %v495_v1, 4  ;;  %v489_v3 = vpop.f32.mrf.mxu1 }
 0x20c   :  { %v497_v4 = vadd.f32 %v496_v2, %v495_v1  ;;  %v611_v1 = vld [vmem:[%s1115_s3 + $0x90] ss:$0 sm:$0xff] }
 0x20e   :  { %v498_v5 = vrot.slane %v497_v4, 2 }
 0x210   :  { %v499_v6 = vadd.f32 %v498_v5, %v497_v4 }
 0x212   :  { %v500_v7 = vrot.slane %v499_v6, 1 }
 0x214   :  { %v501_v8 = vadd.f32 %v500_v7, %v499_v6 }
 0x216   :  { %v502_v9 = vmul.f32 0.125, %v501_v8 }
 0x218   :  { %v503_v10 = vsub.f32 %v491_v63, %v502_v9 }
 0x21a   :  { %v504_v11 = vmul.f32 %v503_v10, %v503_v10  ;;  %v513_v22 = vmul.f32 %v503_v10, %v492_v21 }
 0x21c   :  { %v505_v12 = vsel %vm494_vm2, %v504_v11, 0.0 }
 0x21d   :  { %v506_v13 = vrot.slane %v505_v12, 4 }
 0x21f   :  { %v507_v14 = vadd.f32 %v506_v13, %v505_v12 }
 0x221   :  { %v508_v15 = vrot.slane %v507_v14, 2 }
 0x223   :  { %v509_v16 = vadd.f32 %v508_v15, %v507_v14 }
 0x225   :  { %v510_v17 = vrot.slane %v509_v16, 1 }
 0x227   :  { %v511_v18 = vadd.f32 %v510_v17, %v509_v16 }
 0x229   :  { %v512_v19 = vmul.f32 0.125, %v511_v18 }
 0x22b   :  { %v514_v20 = vadd.f32 1e-05, %v512_v19 }
 0x22d   :  { %839 = vrsqrt.f32 %v514_v20 }
 0x23a   :  { %v840_v23 = vpop.eup %839 }
 0x23b   :  { %v516_v25 = vmul.f32 %v840_v23, %v513_v22 }
 0x23d   :  { %v517_v27 = vadd.f32 %v516_v25, %v493_v24 }
 0x23f   :  { %v519_v28 = vmul.f32 %v518_v26, %v517_v27 }
 0x241   :  { %v520_v29 = vpack.c.bf16 %v519_v28, %v519_v28 }
 0x243   :  { %761 = vmatmul.mubr.msk.bf16.vlgmr.msra.gmra.mxu1 %vm494_vm2, %v520_v29 }
 0x244   :  { %766 = vmatprep.mubr.msk.f32.mxu1 %vm867_vm1, %v866_v57  ;;  %765 = vmatpush3.msra.mxu1 %v610_v30  ;;  %v582_v57 = vld [vmem:[%s1115_s3 + $0x70] ss:$0 sm:$0xff] }
 0x303   :  { %v575_v32 = vpop.f32.mrf.mxu1 }
 0x304   :  { %v576_v33 = vadd.f32 %v575_v32, %v525_v31 }
 0x305   :  { %v762_v34 = vpop.f32.mrf.mxu1 }
 0x306   :  { %v581_v35 = vmax.f32 %v576_v33, 0.0 }
 0x307   :  { %v578_v36 = vpop.f32.mrf.mxu1 }
 0x308   :  { %v585_v37 = vsel %vm584_vm3, %v581_v35, 0.0 }
 0x309   :  { %v586_v38 = vrot.slane %v585_v37, 4  ;;  %v763_v39 = vpop.f32.mrf.mxu1 }
 0x30b   :  { %v587_v40 = vadd.f32 %v586_v38, %v585_v37 }
 0x30d   :  { %v588_v41 = vrot.slane %v587_v40, 2 }
 0x30f   :  { %v589_v42 = vadd.f32 %v588_v41, %v587_v40 }
 0x311   :  { %v590_v43 = vrot.slane %v589_v42, 1 }
 0x313   :  { %v591_v44 = vadd.f32 %v590_v43, %v589_v42 }
 0x315   :  { %v592_v45 = vmul.f32 0.125, %v591_v44 }
 0x317   :  { %v593_v46 = vsub.f32 %v581_v35, %v592_v45 }
 0x319   :  { %v594_v47 = vmul.f32 %v593_v46, %v593_v46  ;;  %v603_v58 = vmul.f32 %v593_v46, %v582_v57 }
 0x31b   :  { %v595_v48 = vsel %vm584_vm3, %v594_v47, 0.0 }
 0x31c   :  { %v596_v49 = vrot.slane %v595_v48, 4 }
 0x31e   :  { %v597_v50 = vadd.f32 %v596_v49, %v595_v48 }
 0x320   :  { %v598_v52 = vrot.slane %v597_v50, 2 }
 0x322   :  { %v599_v54 = vadd.f32 %v598_v52, %v597_v50 }
 0x324   :  { %v600_v55 = vrot.slane %v599_v54, 1 }
 0x326   :  { %v601_v56 = vadd.f32 %v600_v55, %v599_v54 }
 0x328   :  { %v602_v51 = vmul.f32 0.125, %v601_v56 }
 0x32a   :  { %v604_v53 = vadd.f32 1e-05, %v602_v51 }
 0x32c   :  { %841 = vrsqrt.f32 %v604_v53 }
 0x339   :  { %v842_v59 = vpop.eup %841 }
 0x33a   :  { %v606_v61 = vmul.f32 %v842_v59, %v603_v58 }
 0x33c   :  { %v607_v63 = vadd.f32 %v606_v61, %v583_v60 }
 0x33e   :  { %v609_v0 = vmul.f32 %v608_v62, %v607_v63 }
 0x340   :  { %767 = vmatmul.mubr.msk.f32.vlgmr.msra.gmra.mxu1 %vm584_vm3, %v609_v0 }
 0x400   :  { %v681_v2 = vpop.f32.mrf.mxu1 }
 0x401   :  { %v682_v3 = vadd.f32 %v681_v2, %v611_v1 }
 0x402   :  { %v768_v4 = vpop.f32.mrf.mxu1 }
 0x403   :  { %685 = vst [vmem:[#allocation2] sm:$0xff] %v682_v3 }
 0x404   :  { %854 = shalt.err (!%p851_p4)
}
 0x405   :  { %695 = dma.vmem_to_hbm [thread:$0]  %s693_s1, 128, %s1117_s5, [#allocation3]  }
 0x406   :  { %863 = dma.done.wait [#allocation3], 128  }
 0x407   :  { %864 = vsyncadd [#allocation3], 4294967168 }
 0x408   :  { %699 = vsyncpa [#allocation3], 1 }

</bundles_post_ra>
